<compile_context>
chip_gen: v5e
topology: v5e:2x2
jax: 0.10.0
libtpu: 0.0.40
codegen_flags: <defaults>
</compile_context>

<pallas_src>
import functools

import jax
import jax.numpy as jnp
from jax.experimental import pallas as pl
from jax.experimental.pallas import tpu as pltpu

NEG_INF = -9e15
LANE = 128
N_ALIGN = 16          # bf16 sublane tile (16, 128)


def _kdsr_kernel(h_emb_ref, h_img_ref, h_txt_ref, adj_ref, lens_ref,
                 a_ref, w1_ref, b1_ref, w2_ref, out_ref, *, leaky_alpha):
  """One batch block: fused RGAT aggregation + 4-way modality gating + mask."""
  h = h_emb_ref[...]                        # (Bt, N, Dp) bf16
  adj = adj_ref[...].astype(jnp.int32)      # (Bt, N, N)  int8 stream, i32 regs
  a = a_ref[...]                            # (R, Dp) bf16

  bt, n, dp = h.shape
  num_rel = a.shape[0]

  # ---- relational GAT scores: all relations in ONE batched MXU call --------
  # scaled[b, r*N + i, :] = h[b, i, :] * a[r, :]  (broadcast, no concat copy)
  scaled = (h[:, None, :, :] * a[None, :, None, :]).reshape(bt, num_rel * n, dp)
  scores = jnp.einsum('bmd,bjd->bmj', scaled, h,
                      preferred_element_type=jnp.float32)     # (Bt, R*N, N) f32

  # relation select once, LeakyReLU once, mask absent edges to -inf
  sel = scores[:, 0:n, :]
  for r in range(1, num_rel):
    sel = jnp.where(adj == (r + 1), scores[:, r * n:(r + 1) * n, :], sel)
  sel = jnp.where(sel > 0, sel, leaky_alpha * sel)
  alpha = jnp.where((adj > 0) & (adj <= num_rel), sel, NEG_INF)

  # row softmax (rows with no valid relation degenerate to uniform attention,
  # matching PyTorch softmax over an all -9e15 row)
  m = jnp.max(alpha, axis=-1, keepdims=True)
  p = jnp.exp(alpha - m)
  attn = p / jnp.sum(p, axis=-1, keepdims=True)               # (Bt, N, N) f32
  h_rgat = jnp.einsum('bij,bjd->bid', attn.astype(jnp.bfloat16), h,
                      preferred_element_type=jnp.float32)     # (Bt, N, Dp) f32

  # ---- modality gating ------------------------------------------------------
  # Four aligned (Bt*N, Dp) @ (Dp, Dp) MXU calls (same MXU work as one fused
  # call, but zero sublane-concat copies in VMEM).
  w1 = w1_ref[...]                          # (Dp, Dp) bf16
  b1 = b1_ref[...]                          # (1, Dp)  f32
  w2 = w2_ref[...]                          # (1, Dp)  f32
  rows = bt * n

  def energy(x2d_bf16):
    hid = jnp.dot(x2d_bf16, w1, preferred_element_type=jnp.float32) + b1
    hid = jnp.maximum(hid, 0.0)
    # Linear(D,1) as a lane reduction; its scalar bias is shared by all four
    # modalities and cancels in the softmax, so it is omitted.
    return jnp.sum(hid * w2, axis=-1, keepdims=True).reshape(bt, n, 1)

  h_img = h_img_ref[...]                    # (Bt, N, Dp) bf16 (first use here)
  h_txt = h_txt_ref[...]                    # (Bt, N, Dp) bf16

  e0 = energy(h.reshape(rows, dp))
  e1 = energy(h_rgat.astype(jnp.bfloat16).reshape(rows, dp))
  e2 = energy(h_img.reshape(rows, dp))
  e3 = energy(h_txt.reshape(rows, dp))

  e_max = jnp.maximum(jnp.maximum(e0, e1), jnp.maximum(e2, e3))
  x0 = jnp.exp(e0 - e_max)
  x1 = jnp.exp(e1 - e_max)
  x2 = jnp.exp(e2 - e_max)
  x3 = jnp.exp(e3 - e_max)
  inv = 1.0 / (x0 + x1 + x2 + x3)

  out = (x0 * inv) * h + (x1 * inv) * h_rgat \
      + (x2 * inv) * h_img + (x3 * inv) * h_txt                # (Bt,N,Dp) f32

  # ---- session mask: one vectorized iota compare vs per-block lengths -------
  lens = lens_ref[...]                                         # (Bt,1,1) int32
  pos = jax.lax.broadcasted_iota(jnp.int32, (bt, n, dp), 1)
  out_ref[...] = jnp.where(pos < lens, out, 0.0).astype(out_ref.dtype)


def _round_up(x, m):
  return (x + m - 1) // m * m


def _vmem_plan(b, n, dp, num_rel):
  """One consistent per-batch-element VMEM budget -> (Bt, grid, Bp, limit)."""
  try:
    cap = int(pltpu.get_tpu_info().vmem_capacity_bytes)
  except Exception:
    cap = 64 << 20                           # assume the smallest (v7x-sized)
  # generation-aware scoped-VMEM ceiling with compiler-scratch headroom:
  #   v7x (64 MiB physical) -> ~42 MiB;  v5e/v6e (128 MiB) -> ~96 MiB.
  limit_cap = (42 << 20) if cap <= (64 << 20) else (96 << 20)

  # pipelined I/O per batch element (bf16 activations + int8 adj + bf16 out),
  # double-buffered by the BlockSpec pipeline
  io = 4 * n * dp * 2 + n * n + 512
  # dominant in-kernel intermediates per batch element
  interm = (num_rel * n * dp * 2             # scaled              (bf16)
            + num_rel * n * n * 4            # scores              (f32)
            + 3 * n * n * 4                  # sel / alpha / attn  (f32)
            + 6 * n * dp * 4)                # h_rgat / hid / out / upcasts
  per_b = 2 * io + interm
  weights = (num_rel * dp + dp * dp) * 2 + 2 * dp * 4
  headroom = 2 << 20

  bt = max(1, (limit_cap - 2 * weights - headroom) // per_b)
  if b >= 2:                                 # >=2 grid steps: both v7x TCs work
    bt = min(bt, (b + 1) // 2)
  bt = int(min(bt, b))
  g = -(-b // bt)
  bt = -(-b // g)                            # rebalance -> minimal batch padding
  bp = g * bt
  vmem_limit = int(min(limit_cap,
                       max(16 << 20, bt * per_b + 2 * weights + headroom)))
  return bt, g, bp, vmem_limit


def kdsr_forward(params, adj, nodes, node_msks, *, leaky_alpha=0.2,
                 out_dtype=jnp.bfloat16, assert_prefix_mask=False):
  """KDSR.forward (use_CD=False, eval-mode dropout).

  Returns (gated_output [B,N,D] * mask, 0, 0, 0, 0) like the PyTorch module.
  The session mask is rebuilt in-kernel from per-row lengths, assuming the
  usual prefix (1s-then-0s) mask of the KDSR data pipeline.
  """
  # --- glue: embedding lookups (XLA gather), shipped to the kernel in bf16 --
  h_emb = jnp.take(params["embedding"], nodes, axis=0).astype(jnp.bfloat16)
  h_img = jnp.take(params["image_embedding"], nodes, axis=0).astype(jnp.bfloat16)
  h_txt = jnp.take(params["text_embedding"], nodes, axis=0).astype(jnp.bfloat16)
  adj = adj.astype(jnp.int8)                              # relation ids 0..4
  lengths = jnp.sum(node_msks.astype(jnp.int32), axis=-1)  # (B,)

  if assert_prefix_mask:
    try:
      ok = bool(jnp.all(node_msks[:, 1:] <= node_msks[:, :-1]))
      assert ok, "node_msks must be a prefix (1s-then-0s) session mask"
    except Exception:
      pass  # traced inputs: skip the host-side check

  B, N, D = h_emb.shape
  num_rel = params["rgat_a"].shape[0]

  # --- pad D to a lane multiple (128) and N to a bf16 sublane multiple (16) --
  Dp = max(LANE, _round_up(D, LANE))
  Np = _round_up(N, N_ALIGN)
  dpad, npad = Dp - D, Np - N
  if dpad or npad:
    pad3 = ((0, 0), (0, npad), (0, dpad))
    h_emb = jnp.pad(h_emb, pad3)
    h_img = jnp.pad(h_img, pad3)
    h_txt = jnp.pad(h_txt, pad3)
    adj = jnp.pad(adj, ((0, 0), (0, npad), (0, npad)))     # 0 => masked edge
  a = jnp.pad(params["rgat_a"], ((0, 0), (0, dpad))).astype(jnp.bfloat16)
  w1 = jnp.pad(params["mod_w1"], ((0, dpad), (0, dpad))).astype(jnp.bfloat16)
  b1 = jnp.pad(params["mod_b1"], ((0, 0), (0, dpad))).astype(jnp.float32)
  w2 = jnp.pad(params["mod_w2"], ((0, 0), (0, dpad))).astype(jnp.float32)

  # --- batch blocking from one consistent VMEM budget ------------------------
  Bt, G, Bp, vmem_limit = _vmem_plan(B, Np, Dp, num_rel)
  bpad = Bp - B
  if bpad:
    padb3 = ((0, bpad), (0, 0), (0, 0))
    h_emb = jnp.pad(h_emb, padb3)
    h_img = jnp.pad(h_img, padb3)
    h_txt = jnp.pad(h_txt, padb3)
    adj = jnp.pad(adj, padb3)
    lengths = jnp.pad(lengths, ((0, bpad),))
  lens3 = lengths.astype(jnp.int32).reshape(Bp, 1, 1)

  per_batch = lambda g: (g, 0, 0)
  shared = lambda g: (0, 0)

  grid_spec = pltpu.PrefetchScalarGridSpec(
      num_scalar_prefetch=0,
      grid=(G,),
      in_specs=[
          pl.BlockSpec((Bt, Np, Dp), per_batch),   # h_emb (bf16)
          pl.BlockSpec((Bt, Np, Dp), per_batch),   # h_img (bf16)
          pl.BlockSpec((Bt, Np, Dp), per_batch),   # h_txt (bf16)
          pl.BlockSpec((Bt, Np, Np), per_batch),   # adj   (int8 relation ids)
          pl.BlockSpec((Bt, 1, 1), per_batch),     # session lengths (int32)
          pl.BlockSpec((num_rel, Dp), shared),     # RGAT attention vectors
          pl.BlockSpec((Dp, Dp), shared),          # modality W1 (bf16)
          pl.BlockSpec((1, Dp), shared),           # modality b1
          pl.BlockSpec((1, Dp), shared),           # modality w2 (row layout)
      ],
      out_specs=pl.BlockSpec((Bt, Np, Dp), per_batch),
  )

  kernel = functools.partial(_kdsr_kernel, leaky_alpha=leaky_alpha)
  gated = pl.pallas_call(
      kernel,
      out_shape=jax.ShapeDtypeStruct((Bp, Np, Dp), out_dtype),
      grid_spec=grid_spec,
      compiler_params=pltpu.CompilerParams(
          dimension_semantics=("parallel",),       # batch blocks independent
          vmem_limit_bytes=vmem_limit),
  )(h_emb, h_img, h_txt, adj, lens3, a, w1, b1, w2)

  gated = gated[:B, :N, :D]
  zero = jnp.zeros((), jnp.float32)
  return gated, zero, zero, zero, zero


def kdsr_reference(params, adj, nodes, node_msks, *, leaky_alpha=0.2):
  """Pure-JAX f32 reference (same math, no Pallas) for validation."""
  h = jnp.take(params["embedding"], nodes, axis=0)
  h_img = jnp.take(params["image_embedding"], nodes, axis=0)
  h_txt = jnp.take(params["text_embedding"], nodes, axis=0)
  a = params["rgat_a"]
  num_rel = a.shape[0]
  alpha = jnp.full(adj.shape, NEG_INF, jnp.float32)
  for r in range(num_rel):
    e_r = jnp.einsum('bid,bjd->bij', h * a[r][None, None, :], h)
    e_r = jnp.where(e_r > 0, e_r, leaky_alpha * e_r)
    alpha = jnp.where(adj == r + 1, e_r, alpha)
  attn = jax.nn.softmax(alpha, axis=-1)
  h_rgat = jnp.einsum('bij,bjd->bid', attn, h)
  feats = jnp.stack([h, h_rgat, h_img, h_txt], axis=-2)        # (B, N, 4, D)
  hid = jnp.maximum(jnp.einsum('bnmd,de->bnme', feats, params["mod_w1"])
                    + params["mod_b1"], 0.0)
  energy = jnp.einsum('bnme,e->bnm', hid, params["mod_w2"][0])
  w = jax.nn.softmax(energy, axis=-1)
  out = jnp.sum(feats * w[..., None], axis=-2)
  return out * node_msks.astype(jnp.float32)[..., None]


def init_params(key, num_item, dim, num_rel=4):
  ks = jax.random.split(key, 8)
  std = 0.02
  emb = std * jax.random.normal(ks[0], (num_item, dim), jnp.float32)
  img = jax.random.normal(ks[1], (num_item, dim), jnp.float32)
  txt = jax.random.normal(ks[2], (num_item, dim), jnp.float32)
  # padding_idx=0 in the PyTorch embeddings -> zero row 0
  emb = emb.at[0].set(0.0)
  img = img.at[0].set(0.0)
  txt = txt.at[0].set(0.0)
  return {
      "embedding": emb,                 # item-id embedding (normal(0, 0.02))
      "image_embedding": img,           # frozen multimodal features
      "text_embedding": txt,
      # RGAT relation-specific attention vectors a_1..a_4, stacked row-wise
      "rgat_a": std * jax.random.normal(ks[3], (num_rel, dim), jnp.float32),
      # modality_projection = Linear(D,D) -> ReLU -> Linear(D,1)
      # mod_w1 is (in,out) = PyTorch weight.T; mod_w2 is PyTorch (1,D) layout;
      # the Linear(D,1) bias cancels in the softmax.
      "mod_w1": std * jax.random.normal(ks[4], (dim, dim), jnp.float32),
      "mod_b1": jnp.zeros((1, dim), jnp.float32),
      "mod_w2": std * jax.random.normal(ks[5], (1, dim), jnp.float32),
  }


if __name__ == "__main__":
  B, N, D = 2, 8, 32
  NUM_ITEM = 16
  MAX_RELID = 4

  key = jax.random.PRNGKey(0)
  k_param, k_nodes, k_adj = jax.random.split(key, 3)

  params = init_params(k_param, NUM_ITEM, D, MAX_RELID)

  # sessions: first `length` positions are real items, rest are padding (id 0)
  lengths = jnp.array([N, 5], dtype=jnp.int32)
  pos = jnp.arange(N, dtype=jnp.int32)
  node_msks = (pos[None, :] < lengths[:, None]).astype(jnp.int32)   # (B, N)
  nodes = jax.random.randint(k_nodes, (B, N), 1, NUM_ITEM, jnp.int32)
  nodes = nodes * node_msks                                         # (B, N)

  # relational adjacency with relation ids in {0..4}; mask padded rows/cols
  adj = jax.random.randint(k_adj, (B, N, N), 0, MAX_RELID + 1, jnp.int32)
  adj = adj * node_msks[:, :, None] * node_msks[:, None, :]

  out, l1, l2, l3, l4 = kdsr_forward(params, adj, nodes, node_msks,
                                     assert_prefix_mask=True)
  jax.block_until_ready(out)

  assert out.shape == (B, N, D)
  out_f32 = out.astype(jnp.float32)
  assert bool(jnp.all(jnp.isfinite(out_f32)))
  # padded positions are masked to exactly zero
  assert bool(jnp.all(out_f32[1, 5:, :] == 0.0))

  # validate the bf16-I/O kernel against the f32 reference
  ref = kdsr_reference(params, adj, nodes, node_msks)
  err = float(jnp.max(jnp.abs(out_f32 - ref)))
  assert err < 3e-2, f"max abs error vs f32 reference: {err}"

  print("KERNEL_OK")
</pallas_src>

<mosaic_0001>
module attributes {stable_mosaic.version = 11 : i64} {
  func.func @_kdsr_kernel(%arg0: i32, %arg1: memref<1x16x128xbf16, #tpu.memory_space<vmem>>, %arg2: memref<1x16x128xbf16, #tpu.memory_space<vmem>>, %arg3: memref<1x16x128xbf16, #tpu.memory_space<vmem>>, %arg4: memref<1x16x16xi8, #tpu.memory_space<vmem>>, %arg5: memref<1x1x1xi32, #tpu.memory_space<vmem>>, %arg6: memref<4x128xbf16, #tpu.memory_space<vmem>>, %arg7: memref<128x128xbf16, #tpu.memory_space<vmem>>, %arg8: memref<1x128xf32, #tpu.memory_space<vmem>>, %arg9: memref<1x128xf32, #tpu.memory_space<vmem>>, %arg10: memref<1x16x128xbf16, #tpu.memory_space<vmem>>) attributes {dimension_semantics = [#tpu.dimension_semantics<parallel>], iteration_bounds = array<i64: 2>, scalar_prefetch = 0 : i64, scratch_operands = 0 : i64, tpu.core_type = #tpu.core_type<tc>, window_params = [{transform_indices = @transform_0, window_bounds = array<i64: 1, 16, 128>}, {transform_indices = @transform_1, window_bounds = array<i64: 1, 16, 128>}, {transform_indices = @transform_2, window_bounds = array<i64: 1, 16, 128>}, {transform_indices = @transform_3, window_bounds = array<i64: 1, 16, 16>}, {transform_indices = @transform_4, window_bounds = array<i64: 1, 1, 1>}, {pipeline_mode = #tpu.pipeline_mode<synchronous>, transform_indices = @transform_5, window_bounds = array<i64: 4, 128>}, {pipeline_mode = #tpu.pipeline_mode<synchronous>, transform_indices = @transform_6, window_bounds = array<i64: 128, 128>}, {pipeline_mode = #tpu.pipeline_mode<synchronous>, transform_indices = @transform_7, window_bounds = array<i64: 1, 128>}, {pipeline_mode = #tpu.pipeline_mode<synchronous>, transform_indices = @transform_8, window_bounds = array<i64: 1, 128>}, {transform_indices = @transform_9, window_bounds = array<i64: 1, 16, 128>}]} {
    %c0 = arith.constant 0 : index
    %c0_0 = arith.constant 0 : index
    %c0_1 = arith.constant 0 : index
    %0 = vector.load %arg1[%c0, %c0_0, %c0_1] : memref<1x16x128xbf16, #tpu.memory_space<vmem>>, vector<1x16x128xbf16>
    %c0_2 = arith.constant 0 : index
    %c0_3 = arith.constant 0 : index
    %c0_4 = arith.constant 0 : index
    %1 = vector.load %arg4[%c0_2, %c0_3, %c0_4] : memref<1x16x16xi8, #tpu.memory_space<vmem>>, vector<1x16x16xi8>
    %2 = arith.extsi %1 : vector<1x16x16xi8> to vector<1x16x16xi32>
    %c0_5 = arith.constant 0 : index
    %c0_6 = arith.constant 0 : index
    %3 = vector.load %arg6[%c0_5, %c0_6] : memref<4x128xbf16, #tpu.memory_space<vmem>>, vector<4x128xbf16>
    %4 = vector.shape_cast %0 : vector<1x16x128xbf16> to vector<1x1x16x128xbf16>
    %5 = vector.shape_cast %3 : vector<4x128xbf16> to vector<1x4x1x128xbf16>
    %6 = vector.broadcast %4 : vector<1x1x16x128xbf16> to vector<1x4x16x128xbf16>
    %7 = vector.broadcast %5 : vector<1x4x1x128xbf16> to vector<1x4x16x128xbf16>
    %8 = arith.mulf %6, %7 : vector<1x4x16x128xbf16>
    %9 = vector.shape_cast %8 : vector<1x4x16x128xbf16> to vector<1x64x128xbf16>
    "tpu.trace_start"() <{level = 10 : i32, message = "bmd,bjd->bmj"}> : () -> ()
    %cst = arith.constant dense<0.000000e+00> : vector<1x64x16xf32>
    %10 = tpu.matmul %9, %0, %cst {dimension_numbers = #tpu.dot_dimension_numbers<[2], [2], [1], [1], [0, 0, 0, 1, 1, 1], [0], [0]>} : vector<1x64x128xbf16>, vector<1x16x128xbf16>, vector<1x64x16xf32> -> vector<1x64x16xf32>
    "tpu.trace_stop"() : () -> ()
    %11 = vector.extract_strided_slice %10 {offsets = [0, 0, 0], sizes = [1, 16, 16], strides = [1, 1, 1]} : vector<1x64x16xf32> to vector<1x16x16xf32>
    %c2_i32 = arith.constant 2 : i32
    %12 = vector.broadcast %c2_i32 : i32 to vector<1x16x16xi32>
    %13 = arith.cmpi eq, %2, %12 : vector<1x16x16xi32>
    %14 = vector.extract_strided_slice %10 {offsets = [0, 16, 0], sizes = [1, 16, 16], strides = [1, 1, 1]} : vector<1x64x16xf32> to vector<1x16x16xf32>
    %15 = arith.select %13, %14, %11 : vector<1x16x16xi1>, vector<1x16x16xf32>
    %c3_i32 = arith.constant 3 : i32
    %16 = vector.broadcast %c3_i32 : i32 to vector<1x16x16xi32>
    %17 = arith.cmpi eq, %2, %16 : vector<1x16x16xi32>
    %18 = vector.extract_strided_slice %10 {offsets = [0, 32, 0], sizes = [1, 16, 16], strides = [1, 1, 1]} : vector<1x64x16xf32> to vector<1x16x16xf32>
    %19 = arith.select %17, %18, %15 : vector<1x16x16xi1>, vector<1x16x16xf32>
    %c4_i32 = arith.constant 4 : i32
    %20 = vector.broadcast %c4_i32 : i32 to vector<1x16x16xi32>
    %21 = arith.cmpi eq, %2, %20 : vector<1x16x16xi32>
    %22 = vector.extract_strided_slice %10 {offsets = [0, 48, 0], sizes = [1, 16, 16], strides = [1, 1, 1]} : vector<1x64x16xf32> to vector<1x16x16xf32>
    %23 = arith.select %21, %22, %19 : vector<1x16x16xi1>, vector<1x16x16xf32>
    %cst_7 = arith.constant 0.000000e+00 : f32
    %24 = vector.broadcast %cst_7 : f32 to vector<1x16x16xf32>
    %25 = arith.cmpf ogt, %23, %24 : vector<1x16x16xf32>
    %cst_8 = arith.constant 2.000000e-01 : f32
    %26 = vector.broadcast %cst_8 : f32 to vector<1x16x16xf32>
    %27 = arith.mulf %26, %23 : vector<1x16x16xf32>
    %28 = arith.select %25, %23, %27 : vector<1x16x16xi1>, vector<1x16x16xf32>
    %c0_i32 = arith.constant 0 : i32
    %29 = vector.broadcast %c0_i32 : i32 to vector<1x16x16xi32>
    %30 = arith.cmpi sgt, %2, %29 : vector<1x16x16xi32>
    %c4_i32_9 = arith.constant 4 : i32
    %31 = vector.broadcast %c4_i32_9 : i32 to vector<1x16x16xi32>
    %32 = arith.cmpi sle, %2, %31 : vector<1x16x16xi32>
    %33 = arith.andi %30, %32 : vector<1x16x16xi1>
    %cst_10 = arith.constant -9.000000e+15 : f32
    %34 = vector.broadcast %cst_10 : f32 to vector<1x16x16xf32>
    %35 = arith.select %33, %28, %34 : vector<1x16x16xi1>, vector<1x16x16xf32>
    %cst_11 = arith.constant dense<0xFF800000> : vector<1x16xf32>
    %36 = vector.multi_reduction <maximumf>, %35, %cst_11 [2] : vector<1x16x16xf32> to vector<1x16xf32>
    %37 = vector.shape_cast %36 : vector<1x16xf32> to vector<1x16x1xf32>
    %38 = vector.broadcast %37 : vector<1x16x1xf32> to vector<1x16x16xf32>
    %39 = arith.subf %35, %38 : vector<1x16x16xf32>
    %40 = math.exp %39 : vector<1x16x16xf32>
    %cst_12 = arith.constant dense<0.000000e+00> : vector<1x16xf32>
    %41 = vector.multi_reduction <add>, %40, %cst_12 [2] : vector<1x16x16xf32> to vector<1x16xf32>
    %42 = vector.shape_cast %41 : vector<1x16xf32> to vector<1x16x1xf32>
    %43 = vector.broadcast %42 : vector<1x16x1xf32> to vector<1x16x16xf32>
    %44 = arith.divf %40, %43 : vector<1x16x16xf32>
    %45 = arith.truncf %44 : vector<1x16x16xf32> to vector<1x16x16xbf16>
    "tpu.trace_start"() <{level = 10 : i32, message = "bij,bjd->bid"}> : () -> ()
    %cst_13 = arith.constant dense<0.000000e+00> : vector<1x16x128xf32>
    %46 = tpu.matmul %45, %0, %cst_13 {dimension_numbers = #tpu.dot_dimension_numbers<[2], [1], [1], [2], [0, 0, 0, 1, 1, 2], [0], [0]>} : vector<1x16x16xbf16>, vector<1x16x128xbf16>, vector<1x16x128xf32> -> vector<1x16x128xf32>
    "tpu.trace_stop"() : () -> ()
    %c0_14 = arith.constant 0 : index
    %c0_15 = arith.constant 0 : index
    %47 = vector.load %arg7[%c0_14, %c0_15] : memref<128x128xbf16, #tpu.memory_space<vmem>>, vector<128x128xbf16>
    %c0_16 = arith.constant 0 : index
    %c0_17 = arith.constant 0 : index
    %48 = vector.load %arg8[%c0_16, %c0_17] : memref<1x128xf32, #tpu.memory_space<vmem>>, vector<1x128xf32>
    %c0_18 = arith.constant 0 : index
    %c0_19 = arith.constant 0 : index
    %49 = vector.load %arg9[%c0_18, %c0_19] : memref<1x128xf32, #tpu.memory_space<vmem>>, vector<1x128xf32>
    %c0_20 = arith.constant 0 : index
    %c0_21 = arith.constant 0 : index
    %c0_22 = arith.constant 0 : index
    %50 = vector.load %arg2[%c0_20, %c0_21, %c0_22] : memref<1x16x128xbf16, #tpu.memory_space<vmem>>, vector<1x16x128xbf16>
    %c0_23 = arith.constant 0 : index
    %c0_24 = arith.constant 0 : index
    %c0_25 = arith.constant 0 : index
    %51 = vector.load %arg3[%c0_23, %c0_24, %c0_25] : memref<1x16x128xbf16, #tpu.memory_space<vmem>>, vector<1x16x128xbf16>
    %52 = vector.shape_cast %0 : vector<1x16x128xbf16> to vector<16x128xbf16>
    %cst_26 = arith.constant dense<0.000000e+00> : vector<16x128xf32>
    %53 = tpu.matmul %52, %47, %cst_26 {dimension_numbers = #tpu.dot_dimension_numbers<[1], [0], [0], [1], [0, 0, 1, 1], [], []>} : vector<16x128xbf16>, vector<128x128xbf16>, vector<16x128xf32> -> vector<16x128xf32>
    %54 = vector.broadcast %48 : vector<1x128xf32> to vector<16x128xf32>
    %55 = arith.addf %53, %54 : vector<16x128xf32>
    %cst_27 = arith.constant 0.000000e+00 : f32
    %56 = vector.broadcast %cst_27 : f32 to vector<16x128xf32>
    %57 = arith.maximumf %55, %56 : vector<16x128xf32>
    %58 = vector.broadcast %49 : vector<1x128xf32> to vector<16x128xf32>
    %59 = arith.mulf %57, %58 : vector<16x128xf32>
    %cst_28 = arith.constant dense<0.000000e+00> : vector<16xf32>
    %60 = vector.multi_reduction <add>, %59, %cst_28 [1] : vector<16x128xf32> to vector<16xf32>
    %61 = vector.shape_cast %60 : vector<16xf32> to vector<16x1xf32>
    %62 = vector.shape_cast %61 : vector<16x1xf32> to vector<1x16x1xf32>
    %63 = arith.truncf %46 : vector<1x16x128xf32> to vector<1x16x128xbf16>
    %64 = vector.shape_cast %63 : vector<1x16x128xbf16> to vector<16x128xbf16>
    %cst_29 = arith.constant dense<0.000000e+00> : vector<16x128xf32>
    %65 = tpu.matmul %64, %47, %cst_29 {dimension_numbers = #tpu.dot_dimension_numbers<[1], [0], [0], [1], [0, 0, 1, 1], [], []>} : vector<16x128xbf16>, vector<128x128xbf16>, vector<16x128xf32> -> vector<16x128xf32>
    %66 = vector.broadcast %48 : vector<1x128xf32> to vector<16x128xf32>
    %67 = arith.addf %65, %66 : vector<16x128xf32>
    %cst_30 = arith.constant 0.000000e+00 : f32
    %68 = vector.broadcast %cst_30 : f32 to vector<16x128xf32>
    %69 = arith.maximumf %67, %68 : vector<16x128xf32>
    %70 = vector.broadcast %49 : vector<1x128xf32> to vector<16x128xf32>
    %71 = arith.mulf %69, %70 : vector<16x128xf32>
    %cst_31 = arith.constant dense<0.000000e+00> : vector<16xf32>
    %72 = vector.multi_reduction <add>, %71, %cst_31 [1] : vector<16x128xf32> to vector<16xf32>
    %73 = vector.shape_cast %72 : vector<16xf32> to vector<16x1xf32>
    %74 = vector.shape_cast %73 : vector<16x1xf32> to vector<1x16x1xf32>
    %75 = vector.shape_cast %50 : vector<1x16x128xbf16> to vector<16x128xbf16>
    %cst_32 = arith.constant dense<0.000000e+00> : vector<16x128xf32>
    %76 = tpu.matmul %75, %47, %cst_32 {dimension_numbers = #tpu.dot_dimension_numbers<[1], [0], [0], [1], [0, 0, 1, 1], [], []>} : vector<16x128xbf16>, vector<128x128xbf16>, vector<16x128xf32> -> vector<16x128xf32>
    %77 = vector.broadcast %48 : vector<1x128xf32> to vector<16x128xf32>
    %78 = arith.addf %76, %77 : vector<16x128xf32>
    %cst_33 = arith.constant 0.000000e+00 : f32
    %79 = vector.broadcast %cst_33 : f32 to vector<16x128xf32>
    %80 = arith.maximumf %78, %79 : vector<16x128xf32>
    %81 = vector.broadcast %49 : vector<1x128xf32> to vector<16x128xf32>
    %82 = arith.mulf %80, %81 : vector<16x128xf32>
    %cst_34 = arith.constant dense<0.000000e+00> : vector<16xf32>
    %83 = vector.multi_reduction <add>, %82, %cst_34 [1] : vector<16x128xf32> to vector<16xf32>
    %84 = vector.shape_cast %83 : vector<16xf32> to vector<16x1xf32>
    %85 = vector.shape_cast %84 : vector<16x1xf32> to vector<1x16x1xf32>
    %86 = vector.shape_cast %51 : vector<1x16x128xbf16> to vector<16x128xbf16>
    %cst_35 = arith.constant dense<0.000000e+00> : vector<16x128xf32>
    %87 = tpu.matmul %86, %47, %cst_35 {dimension_numbers = #tpu.dot_dimension_numbers<[1], [0], [0], [1], [0, 0, 1, 1], [], []>} : vector<16x128xbf16>, vector<128x128xbf16>, vector<16x128xf32> -> vector<16x128xf32>
    %88 = vector.broadcast %48 : vector<1x128xf32> to vector<16x128xf32>
    %89 = arith.addf %87, %88 : vector<16x128xf32>
    %cst_36 = arith.constant 0.000000e+00 : f32
    %90 = vector.broadcast %cst_36 : f32 to vector<16x128xf32>
    %91 = arith.maximumf %89, %90 : vector<16x128xf32>
    %92 = vector.broadcast %49 : vector<1x128xf32> to vector<16x128xf32>
    %93 = arith.mulf %91, %92 : vector<16x128xf32>
    %cst_37 = arith.constant dense<0.000000e+00> : vector<16xf32>
    %94 = vector.multi_reduction <add>, %93, %cst_37 [1] : vector<16x128xf32> to vector<16xf32>
    %95 = vector.shape_cast %94 : vector<16xf32> to vector<16x1xf32>
    %96 = vector.shape_cast %95 : vector<16x1xf32> to vector<1x16x1xf32>
    %97 = arith.maximumf %62, %74 : vector<1x16x1xf32>
    %98 = arith.maximumf %85, %96 : vector<1x16x1xf32>
    %99 = arith.maximumf %97, %98 : vector<1x16x1xf32>
    %100 = arith.subf %62, %99 : vector<1x16x1xf32>
    %101 = math.exp %100 : vector<1x16x1xf32>
    %102 = arith.subf %74, %99 : vector<1x16x1xf32>
    %103 = math.exp %102 : vector<1x16x1xf32>
    %104 = arith.subf %85, %99 : vector<1x16x1xf32>
    %105 = math.exp %104 : vector<1x16x1xf32>
    %106 = arith.subf %96, %99 : vector<1x16x1xf32>
    %107 = math.exp %106 : vector<1x16x1xf32>
    %108 = arith.addf %101, %103 : vector<1x16x1xf32>
    %109 = arith.addf %108, %105 : vector<1x16x1xf32>
    %110 = arith.addf %109, %107 : vector<1x16x1xf32>
    %cst_38 = arith.constant 1.000000e+00 : f32
    %111 = vector.broadcast %cst_38 : f32 to vector<1x16x1xf32>
    %112 = arith.divf %111, %110 : vector<1x16x1xf32>
    %113 = arith.mulf %101, %112 : vector<1x16x1xf32>
    %114 = arith.extf %0 : vector<1x16x128xbf16> to vector<1x16x128xf32>
    %115 = vector.broadcast %113 : vector<1x16x1xf32> to vector<1x16x128xf32>
    %116 = arith.mulf %115, %114 : vector<1x16x128xf32>
    %117 = arith.mulf %103, %112 : vector<1x16x1xf32>
    %118 = vector.broadcast %117 : vector<1x16x1xf32> to vector<1x16x128xf32>
    %119 = arith.mulf %118, %46 : vector<1x16x128xf32>
    %120 = arith.addf %116, %119 : vector<1x16x128xf32>
    %121 = arith.mulf %105, %112 : vector<1x16x1xf32>
    %122 = arith.extf %50 : vector<1x16x128xbf16> to vector<1x16x128xf32>
    %123 = vector.broadcast %121 : vector<1x16x1xf32> to vector<1x16x128xf32>
    %124 = arith.mulf %123, %122 : vector<1x16x128xf32>
    %125 = arith.addf %120, %124 : vector<1x16x128xf32>
    %126 = arith.mulf %107, %112 : vector<1x16x1xf32>
    %127 = arith.extf %51 : vector<1x16x128xbf16> to vector<1x16x128xf32>
    %128 = vector.broadcast %126 : vector<1x16x1xf32> to vector<1x16x128xf32>
    %129 = arith.mulf %128, %127 : vector<1x16x128xf32>
    %130 = arith.addf %125, %129 : vector<1x16x128xf32>
    %c0_39 = arith.constant 0 : index
    %c0_40 = arith.constant 0 : index
    %c0_41 = arith.constant 0 : index
    %131 = vector.load %arg5[%c0_39, %c0_40, %c0_41] : memref<1x1x1xi32, #tpu.memory_space<vmem>>, vector<1x1x1xi32>
    %132 = tpu.iota {dimensions = array<i32: 1>} : vector<1x16x128xi32>
    %133 = vector.broadcast %131 : vector<1x1x1xi32> to vector<1x16x128xi32>
    %134 = arith.cmpi slt, %132, %133 : vector<1x16x128xi32>
    %cst_42 = arith.constant 0.000000e+00 : f32
    %135 = vector.broadcast %cst_42 : f32 to vector<1x16x128xf32>
    %136 = arith.select %134, %130, %135 : vector<1x16x128xi1>, vector<1x16x128xf32>
    %137 = arith.truncf %136 : vector<1x16x128xf32> to vector<1x16x128xbf16>
    %c0_43 = arith.constant 0 : index
    %c0_44 = arith.constant 0 : index
    %c0_45 = arith.constant 0 : index
    %138 = vector.load %arg10[%c0_43, %c0_44, %c0_45] : memref<1x16x128xbf16, #tpu.memory_space<vmem>>, vector<1x16x128xbf16>
    tpu.vector_store %arg10[%c0_43, %c0_44, %c0_45], %137 {strides = array<i32>} : memref<1x16x128xbf16, #tpu.memory_space<vmem>>, vector<1x16x128xbf16>,
    return
  }
  func.func @transform_0(%arg0: i32) -> (i32, i32, i32) {
    %c0_i32 = arith.constant 0 : i32
    %c0_i32_0 = arith.constant 0 : i32
    %c0_i32_1 = arith.constant 0 : i32
    return %arg0, %c0_i32, %c0_i32_0 : i32, i32, i32
  }
  func.func @transform_1(%arg0: i32) -> (i32, i32, i32) {
    %c0_i32 = arith.constant 0 : i32
    %c0_i32_0 = arith.constant 0 : i32
    %c0_i32_1 = arith.constant 0 : i32
    return %arg0, %c0_i32, %c0_i32_0 : i32, i32, i32
  }
  func.func @transform_2(%arg0: i32) -> (i32, i32, i32) {
    %c0_i32 = arith.constant 0 : i32
    %c0_i32_0 = arith.constant 0 : i32
    %c0_i32_1 = arith.constant 0 : i32
    return %arg0, %c0_i32, %c0_i32_0 : i32, i32, i32
  }
  func.func @transform_3(%arg0: i32) -> (i32, i32, i32) {
    %c0_i32 = arith.constant 0 : i32
    %c0_i32_0 = arith.constant 0 : i32
    %c0_i32_1 = arith.constant 0 : i32
    return %arg0, %c0_i32, %c0_i32_0 : i32, i32, i32
  }
  func.func @transform_4(%arg0: i32) -> (i32, i32, i32) {
    %c0_i32 = arith.constant 0 : i32
    %c0_i32_0 = arith.constant 0 : i32
    %c0_i32_1 = arith.constant 0 : i32
    return %arg0, %c0_i32, %c0_i32_0 : i32, i32, i32
  }
  func.func @transform_5(%arg0: i32) -> (i32, i32) {
    %c0_i32 = arith.constant 0 : i32
    %c0_i32_0 = arith.constant 0 : i32
    %c0_i32_1 = arith.constant 0 : i32
    return %c0_i32, %c0_i32_0 : i32, i32
  }
  func.func @transform_6(%arg0: i32) -> (i32, i32) {
    %c0_i32 = arith.constant 0 : i32
    %c0_i32_0 = arith.constant 0 : i32
    %c0_i32_1 = arith.constant 0 : i32
    return %c0_i32, %c0_i32_0 : i32, i32
  }
  func.func @transform_7(%arg0: i32) -> (i32, i32) {
    %c0_i32 = arith.constant 0 : i32
    %c0_i32_0 = arith.constant 0 : i32
    %c0_i32_1 = arith.constant 0 : i32
    return %c0_i32, %c0_i32_0 : i32, i32
  }
  func.func @transform_8(%arg0: i32) -> (i32, i32) {
    %c0_i32 = arith.constant 0 : i32
    %c0_i32_0 = arith.constant 0 : i32
    %c0_i32_1 = arith.constant 0 : i32
    return %c0_i32, %c0_i32_0 : i32, i32
  }
  func.func @transform_9(%arg0: i32) -> (i32, i32, i32) {
    %c0_i32 = arith.constant 0 : i32
    %c0_i32_0 = arith.constant 0 : i32
    %c0_i32_1 = arith.constant 0 : i32
    return %arg0, %c0_i32, %c0_i32_0 : i32, i32, i32
  }
}

</mosaic_0001>

<bundles_post_ra>
// kernel: tpu_custom_call.1
= control target key start
LH: loop header
LB: loop body
LE: loop exit
PB: predicated region body
PF: predicated region fallthrough
CT: control target
= control target key end

     0   :  { %s2037_s0 = inlined_call_operand.hbm [shape: bf16[2,16,128], index: 0, kind: input, shape index: {}]   ;;  %s2038_s1 = inlined_call_operand.hbm [shape: bf16[2,16,128], index: 1, kind: input, shape index: {}]   ;;  %s2039_s2 = inlined_call_operand.hbm [shape: bf16[2,16,128], index: 2, kind: input, shape index: {}]   ;;  %s2040_s3 = inlined_call_operand.hbm [shape: s8[2,16,16], index: 3, kind: input, shape index: {}]   ;;  %s2041_s4 = inlined_call_operand.vmem [shape: s32[2,1,1], index: 4, kind: input, shape index: {}]   ;;  %s2042_s5 = inlined_call_operand.vmem [shape: bf16[4,128], index: 5, kind: input, shape index: {}]   ;;  %s2043_s6 = inlined_call_operand.hbm [shape: bf16[128,128], index: 6, kind: input, shape index: {}]   ;;  %s2044_s7 = inlined_call_operand.vmem [shape: f32[1,128], index: 7, kind: input, shape index: {}]   ;;  %s2045_s8 = inlined_call_operand.vmem [shape: f32[1,128], index: 8, kind: input, shape index: {}]   ;;  %s2046_s9 = inlined_call_operand.hbm [shape: bf16[2,16,128], index: 9, kind: output, shape index: {}]  }
   0x1   :  { %2060 = sst [smem:[#allocation23_spill]] %s2037_s0 }
   0x2   :  { %2061 = sst [smem:[#allocation24_spill]] %s2038_s1 }
   0x3   :  { %2062 = sst [smem:[#allocation25_spill]] %s2043_s6 }
   0x4   :  { %2063 = sst [smem:[#allocation26_spill]] %s2046_s9 }
   0x5   :  { %14 = vsyncpa [#allocation3], 0 }
   0x6   :  { %16 = vsyncpa [#allocation3 + $0x1], 0 }
   0x7   :  { %17 = vsyncpa [#allocation6], 0 }
   0x8   :  { %19 = vsyncpa [#allocation6 + $0x1], 0 }
   0x9   :  { %20 = vsyncpa [#allocation9], 0 }
   0xa   :  { %22 = vsyncpa [#allocation9 + $0x1], 0 }
   0xb   :  { %23 = vsyncpa [#allocation4], 0 }
   0xc   :  { %25 = vsyncpa [#allocation4 + $0x1], 0  ;;  %s1709_s30 = smov 0   ;;  %s1711_s10 = smov 0  }
   0xd   :  { %s1713_s11 = smov 0   ;;  %s1715_s12 = smov 0  }
   0xe LB: > { %2064 = sst [smem:[#allocation17_spill]] %s1637_s30  ;;  %s1730_s13 = sadd.s32 4294967295, %s1649_s12   ;;  %s1649_s12 = sphi %s1715_s12, %s2086_s12   ;;  %s1645_s11 = sphi %s1713_s11, %s2088_s11   ;;  %s1641_s10 = sphi %s1711_s10, %s2090_s10   ;;  %s1637_s30 = sphi %s1709_s30, %s2089_s30  }
   0xf   : > { %2065 = sst [smem:[#allocation18_spill]] %s1645_s11  ;;  %s1210_s14 = sadd.s32 4294967294, %s1649_s12  }
  0x10   : > { %p51_p0 = scmp.ne.s32.totalorder %s1641_s10, %s1637_s30  ;;  %p52_p1 = scmp.eq.s32.totalorder %s1730_s13, 0 }
  0x11   : > { %p263_p2 = scmp.eq.s32.totalorder %s1730_s13, 1  ;;  %p269_p3 = scmp.eq.s32.totalorder %s1210_s14, 1 }
  0x12   : > { %p1739_p4 = por %p52_p1, %p51_p0  ;;  %p1211_p5 = scmp.ge.s32.totalorder %s1649_s12, 1 }
  0x13   : > { %p1744_p6 = por %p269_p3, %p51_p0  ;;  %p276_p7 = scmp.lt.s32.totalorder %s1649_s12, 3 }
  0x14   : > { %s2069_s6 = sld [smem:[#allocation25_spill]]  ;;  %s1651_s21 = smov [#allocation10]  }
  0x15   : > { %s2067_s16 = scalar_select %p1744_p6, 1, 0 }
  0x16   : > { %p1752_p8 = pnand %p1211_p5, %p276_p7  ;;  %s292_s22 = sshll.u32 %s1651_s21, 4  ;;  %s293_s22 = int_to_ptr.vmem [resolvable:$true] %s292_s22 }
  0x17   : > { %2068 = sst [smem:[#allocation19_spill]] %s2067_s16  ;;  %s1762_s23 = sadd.s32 1, %s1649_s12  }
  0x18   : > { %p1324_p9 = pneg %p1752_p8  ;;  %2071 = sst [smem:[#allocation20_spill]] %s1762_s23 }
  0x19   : > { %s2047_s24 = smov 64   ;;  %s2049_s25 = smov 4  }
  0x1a   : > { %s290_s19 = sshll.u32 %s2069_s6, 4  ;;  %p1325_p10 = pnand %p1324_p9, %p52_p1  ;;  %s291_s19 = int_to_ptr.hbm [resolvable:$true] %s290_s19 }
  0x1b   : > { %s35_s26 = ssub.s32 %s1649_s12, %s1762_s23  ;;  %s38_s27 = sadd.s32 1, %s1645_s11 }
  0x1c   : > { %1327 = dma.hbm_to_vmem [thread:$0]  (!%p1325_p10), %s291_s19, 1024, %s293_s22, [#allocation9], %s2047_s24, %s2047_s24, %s2049_s25  }
  0x1d   : > { %p36_p12 = scmp.eq.s32.totalorder %s35_s26, 0  ;;  %p45_p13 = scmp.ne.s32.totalorder %s1645_s11, %s1641_s10 }
  0x1e   : > { %p46_p0 = scmp.eq.s32.totalorder %s1649_s12, 0  ;;  %p1346_p3 = scmp.lt.s32.totalorder %s1649_s12, 2 }
  0x1f   : > { %s1775_s28 = scalar_select %p36_p12, %s1645_s11, %s38_s27  }
  0x20   : > { %p47_p5 = por %p46_p0, %p45_p13  ;;  %p1779_p7 = por %p263_p2, %p45_p13 }
  0x21   : > { %2072 = sst [smem:[#allocation21_spill]] %s1775_s28  ;;  %s1784_s14 = sand.u32 1, %s1645_s11  }
  0x22   : > { %s2073_s29 = scalar_select %p1779_p7, 1, 0 }
  0x23   : > { %s1787_s17 = sshll.u32 %s1649_s12, 3  ;;  %s1790_s18 = sshll.u32 %s1784_s14, 3 }
  0x24   : > { %2074 = sst [smem:[#allocation22_spill]] %s2073_s29  ;;  %p1792_p9 = pnand %p1346_p3, %p47_p5 }
  0x25   : > { %s2055_s21 = sand.u32 1, %s1649_s12   ;;  %s2076_s1 = sld [smem:[#allocation24_spill]] }
  0x26   : > { %s338_s24 = scalar_lea.vmem [#allocation5], %s1790_s18  ;;  %s1804_s28 = scalar_lea.sflag [#allocation6], %s2055_s21 }
  0x27   : > { %s346_s25 = sshll.u32 %s338_s24, 4  ;;  %p1455_p10 = pneg %p1792_p9  ;;  %s347_s25 = int_to_ptr.vmem [resolvable:$true] %s346_s25 }
  0x2b   : > { %s343_s27 = scalar_lea.hbm %s2076_s1, %s1787_s17  ;;  %s1458_s24 = scalar_lea.hbm %s2076_s1, 16 }
  0x2c   : > { %s344_s6 = sshll.u32 %s343_s27, 4  ;;  %s345_s6 = int_to_ptr.hbm [resolvable:$true] %s344_s6 }
  0x2d   : > { %s1451_s11 = sshra.s32 %s345_s6, 4  ;;  %s1452_s11 = int_to_ptr.hbm [resolvable:$true] %s1451_s11 }
  0x2e   : > { %s1453_s23 = scalar_lea.hbm %s1452_s11, 8  ;;  %p1459_p0 = scmp.lt.s32.totalorder %s1452_s11, %s2076_s1 }
  0x2f   : > { %p1454_p2 = scmp.ne.s32.totalorder %s1452_s11, %s1453_s23  ;;  %p1460_p3 = scmp.lt.s32.totalorder %s1458_s24, %s1453_s23 }
  0x31   : > { %p1456_p12 = pnand %p1455_p10, %p1454_p2  ;;  %p1461_p5 = por %p1460_p3, %p1459_p0 }
  0x33   : > { %p1457_p13 = pneg %p1456_p12 }
  0x35   : > { %p1462_p11 = pnand %p1461_p5, %p1457_p13 }
  0x37   : > { %1465 = shalt.err (!%p1462_p11)
}
  0x38   : > { %s2077_s21 = smov 4   ;;  %s2078_s30 = smov 64  }
  0x39   : > { %1334 = dma.hbm_to_vmem [thread:$0]  (!%p1792_p9), %s345_s6, 128, %s347_s25, %s1804_s28, %s2078_s30, %s2078_s30, %s2077_s21  }
  0x3a   : > { %s2079_s0 = sld [smem:[#allocation23_spill]]  ;;  %s316_s11 = scalar_lea.vmem [#allocation2], %s1790_s18 }
  0x3b   : > { %s324_s23 = sshll.u32 %s316_s11, 4  ;;  %s313_s27 = scalar_lea.sflag [#allocation3], %s1784_s14  ;;  %s325_s23 = int_to_ptr.vmem [resolvable:$true] %s324_s23 }
  0x40   : > { %s321_s16 = scalar_lea.hbm %s2079_s0, %s1787_s17  ;;  %s1488_s25 = scalar_lea.hbm %s2079_s0, 16 }
  0x41   : > { %s322_s24 = sshll.u32 %s321_s16, 4  ;;  %s323_s24 = int_to_ptr.hbm [resolvable:$true] %s322_s24 }
  0x42   : > { %s1481_s1 = sshra.s32 %s323_s24, 4  ;;  %s1482_s1 = int_to_ptr.hbm [resolvable:$true] %s1481_s1 }
  0x43   : > { %s1483_s29 = scalar_lea.hbm %s1482_s1, 8  ;;  %p1489_p13 = scmp.lt.s32.totalorder %s1482_s1, %s2079_s0 }
  0x44   : > { %p1484_p11 = scmp.ne.s32.totalorder %s1482_s1, %s1483_s29  ;;  %p1490_p0 = scmp.lt.s32.totalorder %s1488_s25, %s1483_s29 }
  0x46   : > { %p1486_p2 = pnand %p1484_p11, %p1455_p10  ;;  %p1491_p3 = por %p1490_p0, %p1489_p13 }
  0x48   : > { %p1487_p12 = pneg %p1486_p2 }
  0x4a   : > { %p1492_p5 = pnand %p1491_p3, %p1487_p12 }
  0x4c   : > { %1495 = shalt.err (!%p1492_p5)
}
  0x4d   : > { %1331 = dma.hbm_to_vmem [thread:$0]  (!%p1792_p9), %s323_s24, 128, %s325_s23, %s313_s27, %s2078_s30, %s2078_s30, %s2077_s21  }
  0x4e   : > { %s365_s11 = scalar_lea.hbm %s2039_s2, %s1787_s17  ;;  %s360_s6 = scalar_lea.vmem [#allocation7], %s1790_s18 }
  0x4f   : > { %s368_s1 = sshll.u32 %s360_s6, 4  ;;  %s366_s29 = sshll.u32 %s365_s11, 4  ;;  %s369_s1 = int_to_ptr.vmem [resolvable:$true] %s368_s1  ;;  %s367_s29 = int_to_ptr.hbm [resolvable:$true] %s366_s29 }
  0x50   : > { %s1223_s25 = sshll.u32 %s1784_s14, 2  ;;  %s1511_s22 = sshra.s32 %s367_s29, 4  ;;  %s1512_s22 = int_to_ptr.hbm [resolvable:$true] %s1511_s22 }
  0x51   : > { %s1513_s26 = scalar_lea.hbm %s1512_s22, 8  ;;  %s1518_s24 = scalar_lea.hbm %s2039_s2, 16 }
  0x52   : > { %p1514_p11 = scmp.ne.s32.totalorder %s1512_s22, %s1513_s26  ;;  %p1519_p13 = scmp.lt.s32.totalorder %s1512_s22, %s2039_s2 }
  0x53   : > { %p1520_p0 = scmp.lt.s32.totalorder %s1518_s24, %s1513_s26 }
  0x54   : > { %p1516_p2 = pnand %p1514_p11, %p1455_p10 }
  0x55   : > { %p1521_p3 = por %p1520_p0, %p1519_p13 }
  0x56   : > { %p1517_p12 = pneg %p1516_p2 }
  0x58   : > { %p1522_p5 = pnand %p1521_p3, %p1517_p12 }
  0x5a   : > { %1525 = shalt.err (!%p1522_p5)
}
  0x5b   : > { %1337 = dma.hbm_to_vmem [thread:$0]  (!%p1792_p9), %s367_s29, 128, %s369_s1, %s1804_s28, %s2078_s30, %s2078_s30, %s2077_s21  }
  0x5c   : > { %s1288_s0 = sshll.u32 %s1649_s12, 2  ;;  %s382_s16 = scalar_lea.vmem [#allocation8], %s1223_s25 }
  0x5d   : > { %s387_s9 = scalar_lea.hbm %s2040_s3, %s1288_s0  ;;  %s390_s11 = sshll.u32 %s382_s16, 4  ;;  %s391_s11 = int_to_ptr.vmem [resolvable:$true] %s390_s11 }
  0x5e   : > { %s388_s6 = sshll.u32 %s387_s9, 4  ;;  %s2080_s22 = sand.u32 1, %s1649_s12   ;;  %s389_s6 = int_to_ptr.hbm [resolvable:$true] %s388_s6 }
  0x5f   : > { %s379_s26 = scalar_lea.sflag [#allocation9], %s2080_s22  ;;  %s1541_s23 = sshra.s32 %s389_s6, 4  ;;  %s1542_s23 = int_to_ptr.hbm [resolvable:$true] %s1541_s23 }
  0x60   : > { %s1543_s24 = scalar_lea.hbm %s1542_s23, 4  ;;  %s1548_s21 = scalar_lea.hbm %s2040_s3, 8 }
  0x61   : > { %p1544_p11 = scmp.ne.s32.totalorder %s1542_s23, %s1543_s24  ;;  %p1549_p13 = scmp.lt.s32.totalorder %s1542_s23, %s2040_s3 }
  0x62   : > { %p1550_p0 = scmp.lt.s32.totalorder %s1548_s21, %s1543_s24 }
  0x63   : > { %p1546_p2 = pnand %p1544_p11, %p1455_p10 }
  0x64   : > { %p1551_p3 = por %p1550_p0, %p1549_p13 }
  0x65   : > { %p1547_p12 = pneg %p1546_p2 }
  0x67   : > { %p1552_p5 = pnand %p1551_p3, %p1547_p12 }
  0x69   : > { %1555 = shalt.err (!%p1552_p5)
}
  0x6a   : > { %s1654_s25 = smov 32   ;;  %s1655_s27 = smov 2  }
  0x6b   : > { %1340 = dma.hbm_to_vmem [thread:$0]  (!%p1792_p9), %s389_s6, 64, %s391_s11, %s379_s26, %s1654_s25, %s1654_s25, %s1655_s27  }
  0x6c   : > { %408 = sbr.rel (%p1752_p8) target bundleno = 1069 (0x42d), region = 56  ;;  %s1884_s17 = sand.u32 (!%p1752_p8), 1, %s1641_s10  }
  0x6d   : > { %s1887_s0 = sshll.u32 (!%p1752_p8), %s1884_s17, 3  ;;  %s411_s14 = scalar_lea.sflag (!%p1752_p8), [#allocation3], %s1884_s17 }
  0x6e   : > { %s414_s18 = scalar_lea.vmem (!%p1752_p8), [#allocation2], %s1887_s0 }
  0x71   : > { %1616 = dma.done.wait (%p1739_p4), %s411_s14, 128  }
  0x72   : > { %1618 = vsyncadd (%p1739_p4), %s411_s14, 4294967168  ;;  %s420_s20 = sand.u32 1, %s1730_s13   ;;  %s424_s9 = scalar_lea.vmem [#allocation5], %s1887_s0 }
  0x73   : > { %s421_s19 = scalar_lea.sflag [#allocation6], %s420_s20 }
  0x74   : > { %1620 = dma.done.wait (%p1739_p4), %s421_s19, 256  }
  0x75   : > { %1622 = vsyncadd (%p1739_p4), %s421_s19, 4294967040  ;;  %s1230_s16 = sshll.u32 %s1884_s17, 2  ;;  %s434_s11 = scalar_lea.vmem [#allocation7], %s1887_s0 }
  0x76   : > { %s441_s6 = scalar_lea.sflag [#allocation9], %s420_s20  ;;  %s1903_s22 = scalar_lea.vmem [#allocation8], %s1230_s16 }
  0x77   : > { %1624 = dma.done.wait (%p1739_p4), %s441_s6, 64  }
  0x78   : > { %1626 = vsyncadd (%p1739_p4), %s441_s6, 4294967232 }
  0x79   : > { %1628 = dma.done.wait (%p52_p1), [#allocation9], 1024  }
  0x7a   : > { %1630 = vsyncadd (%p52_p1), [#allocation9], 4294966272  ;;  %v1915_v0 = vld [vmem:[%s414_s18] sm:$0xff]  ;;  %vm518_vm0 = vcmask 1040384   ;;  %vm522_vm1 = vcmask 1042434   ;;  %vm526_vm2 = vcmask 1041408  }
  0x7b   : > { %v513_v1 = vld [vmem:[%s2042_s5] sm:$0x3]  ;;  %624 = vmatpush.bf16.xpose.msra.mxu0 %v1915_v0  ;;  %738 = vmatpush.bf16.msra.mxu1 %v1915_v0  ;;  %vm529_vm3 = vcmask 1041409   ;;  %vm531_vm4 = vcmask 1043459   ;;  %vm533_vm5 = vcmask 1042433   ;;  %vm672_vm13 = vcmask 130048  }
  0x7c   : > { %v515_v2 = vrot.slane %v513_v1, 1  ;;  %v516_v3 = vrot.slane %v513_v1, 2  ;;  %v517_v4 = vrot.slane %v513_v1, 3  ;;  %v507_v12 = vld [vmem:[%s414_s18] sm:$0xff]   ;;  %p503_p1 = scmp.lt.s32.totalorder %s1730_s13, 1  ;;  %s1300_s18 = sshll.u32 %s1730_s13, 3 }
  0x7d   : > { %v1924_v18 = vunpack.c.l.bf16 %v507_v12  ;;  %v1926_v19 = vunpack.c.h.bf16 %v507_v12  ;;  %s1038_s26 = scalar_lea.sflag [#allocation4], %s1884_s17 }
  0x7e   : > { %v521_v5 = vsel %vm518_vm0, %v513_v1, %v515_v2  ;;  %v525_v6 = vsel %vm522_vm1, %v516_v3, %v517_v4  ;;  %v530_v15 = vsel %vm529_vm3, %v513_v1, %v515_v2  ;;  %v532_v16 = vsel %vm531_vm4, %v516_v3, %v517_v4  ;;  %s1981_s21 = scalar_select %p503_p1, %s1730_s13, 1 }
  0x7f   : > { %v527_v7 = vsel %vm526_vm2, %v521_v5, %v525_v6  ;;  %v534_v21 = vsel %vm533_vm5, %v530_v15, %v532_v16 }
  0x80   : > { %v1233_v8 = vpack.i.b16 %v527_v7, %v527_v7  ;;  %v538_v9 = vunpack.i.h.s16 %v527_v7  ;;  %v536_v26 = vrot.slane %v534_v21, 1  ;;  %v1307_v7 = vld [vmem:[%s1903_s22] sm:$0xf]   ;;  %s505_s25 = scalar_lea.vmem %s2041_s4, %s1981_s21 }
  0x82   : > { %v545_v10 = vperm.slane %v1233_v8, 0  ;;  %v542_v11 = vpack.i.b16 %v538_v9, %v538_v9  ;;  %v1234_v32 = vpack.i.b16 %v536_v26, %v536_v26  ;;  %v540_v43 = vunpack.i.h.s16 %v536_v26 }
  0x83   : > { %v1308_v8 = vunpack.c.0.s8 %v1307_v7 }
  0x84   : > { %v550_v13 = vpack.i.b16 %v545_v10, %v545_v10  ;;  %v546_v14 = vperm.slane %v542_v11, 0  ;;  %v547_v36 = vperm.slane %v1234_v32, 0  ;;  %v544_v46 = vpack.i.b16 %v540_v43, %v540_v43 }
  0x85   : > { %vm646_vm6 = vcmp.eq.s32.totalorder %v1308_v8, 2  ;;  %vm650_vm7 = vcmp.eq.s32.totalorder %v1308_v8, 3  ;;  %vm654_vm8 = vcmp.eq.s32.totalorder %v1308_v8, 4  ;;  %vm664_vm9 = vcmp.gt.s32.totalorder %v1308_v8, 0 }
  0x86   : > { %v552_v17 = vperm.slane %v550_v13, 0  ;;  %v554_v20 = vpack.i.b16 %v546_v14, %v546_v14  ;;  %v558_v39 = vpack.i.b16 %v547_v36, %v547_v36  ;;  %v548_v49 = vperm.slane %v544_v46, 0 }
  0x87   : > { %vm666_vm10 = vcmp.le.s32.totalorder %v1308_v8, 4  ;;  %v1309_v11 = vunpack.c.1.s8 %v1307_v7 }
  0x88   : > { %v567_v22 = vunpack.c.l.bf16 %v552_v17  ;;  %v556_v25 = vperm.slane %v554_v20, 0  ;;  %v560_v42 = vperm.slane %v558_v39, 0  ;;  %v562_v52 = vpack.i.b16 %v548_v49, %v548_v49  ;;  %vm668_vm12 = vmand %vm664_vm9, %vm666_vm10 }
  0x89   : > { %vm647_vm14 = vcmp.eq.s32.totalorder %v1309_v11, 2  ;;  %vm651_vm15 = vcmp.eq.s32.totalorder %v1309_v11, 3  ;;  %vm655_vm0 = vcmp.eq.s32.totalorder %v1309_v11, 4  ;;  %vm665_vm1 = vcmp.gt.s32.totalorder %v1309_v11, 0 }
  0x8a   : > { %v571_v23 = vmul.f32 %v567_v22, %v1924_v18  ;;  %v572_v24 = vmul.f32 %v567_v22, %v1926_v19  ;;  %v568_v31 = vunpack.c.l.bf16 %v556_v25  ;;  %v569_v45 = vunpack.c.l.bf16 %v560_v42 }
  0x8b   : > { %v564_v55 = vperm.slane %v562_v52, 0  ;;  %vm667_vm2 = vcmp.le.s32.totalorder %v1309_v11, 4 }
  0x8c   : > { %v579_v27 = vpack.c.bf16 %v571_v23, %v571_v23  ;;  %v580_v28 = vpack.c.bf16 %v572_v24, %v572_v24  ;;  %v573_v34 = vmul.f32 %v568_v31, %v1924_v18  ;;  %v574_v35 = vmul.f32 %v568_v31, %v1926_v19  ;;  %vm669_vm4 = vmand %vm665_vm1, %vm667_vm2 }
  0x8d   : > { %v575_v47 = vmul.f32 %v569_v45, %v1924_v18  ;;  %v576_v48 = vmul.f32 %v569_v45, %v1926_v19  ;;  %v570_v57 = vunpack.c.l.bf16 %v564_v55  ;;  %v1949_v45 = vld [vmem:[#allocation10 + $0x28] sm:$0xff]  ;;  %v1293_v55 = vld [vmem:[#allocation10 + $0x18] sm:$0xff] }
  0x8e   : > { %v595_v29 = vunpack.c.l.b16 %v579_v27  ;;  %v596_v30 = vunpack.c.l.b16 %v580_v28  ;;  %v581_v37 = vpack.c.bf16 %v573_v34, %v573_v34  ;;  %v582_v38 = vpack.c.bf16 %v574_v35, %v574_v35 }
  0x8f   : > { %v583_v50 = vpack.c.bf16 %v575_v47, %v575_v47  ;;  %v584_v51 = vpack.c.bf16 %v576_v48, %v576_v48  ;;  %v577_v58 = vmul.f32 %v570_v57, %v1924_v18  ;;  %v578_v59 = vmul.f32 %v570_v57, %v1926_v19  ;;  %v1294_v48 = vld [vmem:[#allocation10 + $0x20] sm:$0xff] }
  0x90   : > { %v603_v33 = vpack.c.b16 %v596_v30, %v595_v29  ;;  %v597_v40 = vunpack.c.l.b16 %v581_v37  ;;  %v598_v41 = vunpack.c.l.b16 %v582_v38 }
  0x91   : > { %v599_v53 = vunpack.c.l.b16 %v583_v50  ;;  %v600_v54 = vunpack.c.l.b16 %v584_v51  ;;  %v585_v60 = vpack.c.bf16 %v577_v58, %v577_v58  ;;  %v586_v61 = vpack.c.bf16 %v578_v59, %v578_v59 }
  0x92   : > { %625 = vmatmul.bf16.vlgmr.msra.gmra.mxu0 %v603_v33  ;;  %v604_v44 = vpack.c.b16 %v598_v41, %v597_v40  ;;  %v1941_v40 = vld [vmem:[#allocation10 + $0x38] sm:$0xff]  ;;  %v1944_v41 = vld [vmem:[#allocation10 + $0x30] sm:$0xff] }
  0x93   : > { %v605_v56 = vpack.c.b16 %v600_v54, %v599_v53  ;;  %v601_v62 = vunpack.c.l.b16 %v585_v60  ;;  %v602_v63 = vunpack.c.l.b16 %v586_v61  ;;  %818 = vmatpush.bf16.msra.mxu2 %v1941_v40  ;;  %851 = vmatpush.bf16.msra.mxu3 %v1941_v40 }
  0x94   : > { %879 = vmatpush.bf16.msrb.mxu1 %v1941_v40 }
  0x95   : > { %v606_v1 = vpack.c.b16 %v602_v63, %v601_v62  ;;  %v1292_v62 = vld [vmem:[#allocation10 + $0x10] sm:$0xff] }
  0x97   : > { %819 = vmatpush.bf16.msra.mxu2 %v1944_v41  ;;  %852 = vmatpush.bf16.msra.mxu3 %v1944_v41 }
  0x98   : > { %880 = vmatpush.bf16.msrb.mxu1 %v1944_v41 }
  0x9b   : > { %820 = vmatpush.bf16.msra.mxu2 %v1949_v45  ;;  %853 = vmatpush.bf16.msra.mxu3 %v1949_v45 }
  0x9c   : > { %881 = vmatpush.bf16.msrb.mxu1 %v1949_v45 }
  0x9f   : > { %821 = vmatpush.bf16.msra.mxu2 %v1294_v48  ;;  %854 = vmatpush.bf16.msra.mxu3 %v1294_v48 }
  0xa0   : > { %882 = vmatpush.bf16.msrb.mxu1 %v1294_v48 }
  0xa2   : > { %630 = vmatmul.bf16.gmra.mxu0 %v604_v44 }
  0xa3   : > { %822 = vmatpush.bf16.msra.mxu2 %v1293_v55  ;;  %855 = vmatpush.bf16.msra.mxu3 %v1293_v55 }
  0xa4   : > { %883 = vmatpush.bf16.msrb.mxu1 %v1293_v55 }
  0xa7   : > { %823 = vmatpush.bf16.msra.mxu2 %v1292_v62  ;;  %856 = vmatpush.bf16.msra.mxu3 %v1292_v62 }
  0xa8   : > { %884 = vmatpush.bf16.msrb.mxu1 %v1292_v62 }
  0xb2   : > { %635 = vmatmul.bf16.gmra.mxu0 %v605_v56 }
  0xc2   : > { %640 = vmatmul.bf16.gmra.mxu0 %v606_v1 }
 0x10f   : > { %v626_v2 = vpop.f32.mrf.mxu0 }
 0x117   : > { %v628_v3 = vpop.f32.mrf.mxu0 }
 0x11f   : > { %v631_v4 = vpop.f32.mrf.mxu0 }
 0x120   : > { %v648_v10 = vsel %vm646_vm6, %v631_v4, %v626_v2  ;;  %v1291_v4 = vld [vmem:[#allocation10 + $0x8] sm:$0xff] }
 0x121   : > { %824 = vmatpush.bf16.msra.mxu2 %v1291_v4  ;;  %857 = vmatpush.bf16.msra.mxu3 %v1291_v4 }
 0x122   : > { %885 = vmatpush.bf16.msrb.mxu1 %v1291_v4 }
 0x127   : > { %v633_v5 = vpop.f32.mrf.mxu0 }
 0x128   : > { %v649_v21 = vsel %vm647_vm14, %v633_v5, %v628_v3 }
 0x12f   : > { %v636_v6 = vpop.f32.mrf.mxu0 }
 0x130   : > { %v652_v12 = vsel %vm650_vm7, %v636_v6, %v648_v10 }
 0x137   : > { %v638_v9 = vpop.f32.mrf.mxu0 }
 0x138   : > { %v653_v22 = vsel %vm651_vm15, %v638_v9, %v649_v21  ;;  %v1290_v9 = vld [vmem:[#allocation10] sm:$0xff] }
 0x139   : > { %825 = vmatpush.bf16.msra.mxu2 %v1290_v9  ;;  %858 = vmatpush.bf16.msra.mxu3 %v1290_v9 }
 0x13a   : > { %886 = vmatpush.bf16.msrb.mxu1 %v1290_v9 }
 0x13c   : > { %826 = vmatmul.bf16.vlgmr.msra.gmra.mxu2 %v1915_v0  ;;  %v1390_v0 = vld [vmem:[%s2044_s7] ss:$0 sm:$0xff] }
 0x13d   : > { %907 = vmatpush.bf16.msrb.mxu2 %v1941_v40 }
 0x13f   : > { %v641_v13 = vpop.f32.mrf.mxu0 }
 0x140   : > { %v656_v14 = vsel %vm654_vm8, %v641_v13, %v652_v12  ;;  %v1299_v13 = vld [vmem:[%s434_s11] sm:$0xff] }
 0x141   : > { %v660_v15 = vmul.f32 0.2, %v656_v14  ;;  %vm658_vm11 = vcmp.gt.f32.partialorder %v656_v14, 0.0  ;;  %908 = vmatpush.bf16.msrb.mxu2 %v1944_v41 }
 0x143   : > { %v662_v16 = vsel %vm658_vm11, %v656_v14, %v660_v15  ;;  %v1298_v14 = vld [vmem:[%s424_s9] sm:$0xff] }
 0x144   : > { %v670_v17 = vsel %vm668_vm12, %v662_v16, -9e+15 }
 0x145   : > { %v673_v20 = vsel %vm672_vm13, %v670_v17, -inf  ;;  %909 = vmatpush.bf16.msrb.mxu2 %v1949_v45 }
 0x146   : > { %674 = vmax.xlane.f32.xlu0 %v673_v20 }
 0x147   : > { %v643_v23 = vpop.f32.mrf.mxu0 }
 0x148   : > { %v657_v24 = vsel %vm655_vm0, %v643_v23, %v653_v22  ;;  %v1391_v22 = vld [vmem:[%s2045_s8] ss:$0 sm:$0xff] }
 0x149   : > { %vm659_vm3 = vcmp.gt.f32.partialorder %v657_v24, 0.0  ;;  %v661_v25 = vmul.f32 0.2, %v657_v24  ;;  %910 = vmatpush.bf16.msrb.mxu2 %v1294_v48 }
 0x14b   : > { %v663_v26 = vsel %vm659_vm3, %v657_v24, %v661_v25 }
 0x14c   : > { %v671_v27 = vsel %vm669_vm4, %v663_v26, -9e+15 }
 0x14d   : > { %v676_v28 = vsel %vm672_vm13, %v671_v27, -inf  ;;  %911 = vmatpush.bf16.msrb.mxu2 %v1293_v55 }
 0x14e   : > { %677 = vmax.xlane.f32.xlu0 %v676_v28 }
 0x151   : > { %912 = vmatpush.bf16.msrb.mxu2 %v1292_v62 }
 0x155   : > { %913 = vmatpush.bf16.msrb.mxu2 %v1291_v4 }
 0x159   : > { %914 = vmatpush.bf16.msrb.mxu2 %v1290_v9 }
 0x15c   : > { %915 = vmatmul.bf16.vlgmr.msrb.gmra.mxu2 %v1299_v13 }
 0x1b9   : > { %v675_v29 = vpop.xlane.xlu0 %674 }
 0x1ba   : > { %v679_v30 = vsub.f32 %v670_v17, %v675_v29 }
 0x1bc   : > { %v681_v31 = vmul.f32 1.442695, %v679_v30 }
 0x1be   : > { %1393 = vpow2.f32 %v681_v31 }
 0x1bf   : > { %v827_v17 = vpop.f32.mrf.mxu2 }
 0x1c0   : > { %v828_v21 = vadd.f32 %v1390_v0, %v827_v17 }
 0x1c1   : > { %v678_v32 = vpop.xlane.xlu0 %677 }
 0x1c2   : > { %v680_v33 = vsub.f32 %v671_v27, %v678_v32  ;;  %v832_v24 = vmax.f32 %v828_v21, 0.0 }
 0x1c4   : > { %v1394_v34 = vpop.eup %1393  ;;  %v683_v35 = vmul.f32 1.442695, %v680_v33  ;;  %v837_v27 = vmul.f32 %v1391_v22, %v832_v24 }
 0x1c5   : > { %v685_v36 = vsel %vm672_vm13, %v1394_v34, 0.0 }
 0x1c6   : > { %1395 = vpow2.f32 %v683_v35  ;;  %686 = vadd.xlane.f32.xlu1 %v685_v36  ;;  %839 = vadd.xlane.f32.xlu2 %v837_v27 }
 0x1c7   : > { %v829_v29 = vpop.f32.mrf.mxu2 }
 0x1c8   : > { %v830_v30 = vadd.f32 %v1390_v0, %v829_v29 }
 0x1ca   : > { %v833_v31 = vmax.f32 %v830_v30, 0.0 }
 0x1cc   : > { %v1396_v37 = vpop.eup %1395  ;;  %v838_v32 = vmul.f32 %v1391_v22, %v833_v31 }
 0x1cd   : > { %v688_v38 = vsel %vm672_vm13, %v1396_v37, 0.0 }
 0x1ce   : > { %689 = vadd.xlane.f32.xlu1 %v688_v38  ;;  %841 = vadd.xlane.f32.xlu2 %v838_v32 }
 0x239   : > { %v687_v39 = vpop.xlane.xlu1 %686 }
 0x23a   : > { %1397 = vrcp.f32 %v687_v39  ;;  %v702_v49 = vand.u32 2147483648, %v687_v39  ;;  %vm696_vm6 = vweird.f32 %v687_v39  ;;  %v700_v51 = vand.u32 2147483647, %v687_v39 }
 0x23c   : > { %v703_v56 = vor.u32 1.1754944e-38, %v702_v49  ;;  %vm701_vm8 = vcmp.eq.f32.partialorder %v700_v51, 8.507059e+37 }
 0x240   : > { %v1398_v42 = vpop.eup %1397 }
 0x241   : > { %v692_v43 = vmul.f32 %v1398_v42, %v687_v39  ;;  %v690_v44 = vpop.xlane.xlu1 %689  ;;  %vm697_vm5 = vweird.f32 %v1398_v42 }
 0x242   : > { %1399 = vrcp.f32 %v690_v44  ;;  %vm698_vm7 = vmor %vm696_vm6, %vm697_vm5  ;;  %v717_v58 = vand.u32 2147483648, %v690_v44  ;;  %v715_v61 = vand.u32 2147483647, %v690_v44  ;;  %vm711_vm10 = vweird.f32 %v690_v44 }
 0x243   : > { %v693_v46 = vsub.f32 1.0, %v692_v43 }
 0x244   : > { %v718_v2 = vor.u32 1.1754944e-38, %v717_v58  ;;  %vm716_vm12 = vcmp.eq.f32.partialorder %v715_v61, 8.507059e+37  ;;  %v1392_v58 = vld [vmem:[%s505_s25] ss:$0 sm:$0xff] }
 0x245   : > { %v694_v47 = vmul.f32 %v1398_v42, %v693_v46 }
 0x247   : > { %v695_v50 = vadd.f32 %v1398_v42, %v694_v47 }
 0x248   : > { %v1400_v52 = vpop.eup %1399 }
 0x249   : > { %v707_v53 = vmul.f32 %v1400_v52, %v690_v44  ;;  %v699_v54 = vsel %vm698_vm7, %v1398_v42, %v695_v50  ;;  %vm712_vm9 = vweird.f32 %v1400_v52  ;;  %v1656_v42 = vmov 0  }
 0x24a   : > { %v704_v59 = vsel %vm701_vm8, %v703_v56, %v699_v54  ;;  %vm713_vm11 = vmor %vm711_vm10, %vm712_vm9  ;;  %1389 = vset.pattern.permute.xlu0 %v1656_v42 }
 0x24b   : > { %v708_v57 = vsub.f32 1.0, %v707_v53  ;;  %v705_v1 = vmul.f32 %v1394_v34, %v704_v59  ;;  %v916_v34 = vpop.f32.mrf.mxu2  ;;  %v840_v59 = vpop.xlane.xlu2 %839 }
 0x24c   : > { %v917_v54 = vadd.f32 %v1390_v0, %v916_v34 }
 0x24d   : > { %v709_v60 = vmul.f32 %v1400_v52, %v708_v57  ;;  %v721_v7 = vpack.c.bf16 %v705_v1, %v705_v1 }
 0x24e   : > { %v921_v56 = vmax.f32 %v917_v54, 0.0 }
 0x24f   : > { %v710_v63 = vadd.f32 %v1400_v52, %v709_v60  ;;  %v725_v10 = vunpack.c.l.b16 %v721_v7 }
 0x250   : > { %v923_v57 = vmul.f32 %v1391_v22, %v921_v56 }
 0x251   : > { %v714_v3 = vsel %vm713_vm11, %v1400_v52, %v710_v63 }
 0x252   : > { %v719_v5 = vsel %vm716_vm12, %v718_v2, %v714_v3 }
 0x253   : > { %v720_v6 = vmul.f32 %v1396_v37, %v719_v5  ;;  %v918_v38 = vpop.f32.mrf.mxu2  ;;  %v842_v60 = vpop.xlane.xlu2 %841 }
 0x254   : > { %v919_v39 = vadd.f32 %v1390_v0, %v918_v38 }
 0x255   : > { %v722_v8 = vpack.c.bf16 %v720_v6, %v720_v6 }
 0x256   : > { %v922_v40 = vmax.f32 %v919_v39, 0.0 }
 0x257   : > { %v726_v11 = vunpack.c.l.b16 %v722_v8 }
 0x258   : > { %v924_v41 = vmul.f32 %v1391_v22, %v922_v40 }
 0x259   : > { %v727_v12 = vpack.c.b16 %v726_v11, %v725_v10 }
 0x25b   : > { %1239 = vmatmul.msk.bf16.vlgmr.msra.gmra.mxu1 %vm672_vm13, %v727_v12 }
 0x26b   : > { %887 = vmatmul.bf16.vlgmr.msrb.gmra.mxu1 %v1298_v14 }
 0x2d8   : > { %v1965_v15 = vpop.f32.mrf.mxu1 }
 0x2d9   : > { %v843_v16 = vpack.c.bf16 %v1965_v15, %v1965_v15 }
 0x2db   : > { %v847_v25 = vunpack.c.l.b16 %v843_v16 }
 0x2e0   : > { %v1972_v20 = vpop.f32.mrf.mxu1 }
 0x2e1   : > { %v844_v23 = vpack.c.bf16 %v1972_v20, %v1972_v20 }
 0x2e3   : > { %v848_v26 = vunpack.c.l.b16 %v844_v23 }
 0x2e5   : > { %v849_v28 = vpack.c.b16 %v848_v26, %v847_v25 }
 0x2e7   : > { %859 = vmatmul.bf16.vlgmr.msra.gmra.mxu3 %v849_v28 }
 0x2e8   : > { %v888_v33 = vpop.f32.mrf.mxu1 }
 0x2e9   : > { %v889_v35 = vadd.f32 %v1390_v0, %v888_v33 }
 0x2eb   : > { %v893_v36 = vmax.f32 %v889_v35, 0.0 }
 0x2ed   : > { %v895_v37 = vmul.f32 %v1391_v22, %v893_v36 }
 0x2ef   : > { %897 = vadd.xlane.f32.xlu2 %v895_v37 }
 0x2f0   : > { %v890_v44 = vpop.f32.mrf.mxu1 }
 0x2f1   : > { %v891_v47 = vadd.f32 %v1390_v0, %v890_v44 }
 0x2f3   : > { %v894_v49 = vmax.f32 %v891_v47, 0.0 }
 0x2f5   : > { %v896_v53 = vmul.f32 %v1391_v22, %v894_v49 }
 0x2f7   : > { %927 = vadd.xlane.f32.xlu2 %v924_v41 }
 0x362   : > { %v898_v61 = vpop.xlane.xlu2 %897 }
 0x36a   : > { %v860_v43 = vpop.f32.mrf.mxu3  ;;  %v928_v63 = vpop.xlane.xlu2 %927 }
 0x36b   : > { %v861_v45 = vadd.f32 %v1390_v0, %v860_v43 }
 0x36d   : > { %v865_v46 = vmax.f32 %v861_v45, 0.0 }
 0x36f   : > { %v867_v48 = vmul.f32 %v1391_v22, %v865_v46 }
 0x371   : > { %869 = vadd.xlane.f32.xlu0 %v867_v48 }
 0x372   : > { %v862_v50 = vpop.f32.mrf.mxu3 }
 0x373   : > { %v863_v51 = vadd.f32 %v1390_v0, %v862_v50 }
 0x375   : > { %v866_v52 = vmax.f32 %v863_v51, 0.0 }
 0x377   : > { %v868_v55 = vmul.f32 %v1391_v22, %v866_v52 }
 0x379   : > { %871 = vadd.xlane.f32.xlu1 %v868_v55  ;;  %899 = vadd.xlane.f32.xlu0 %v896_v53 }
 0x381   : > { %925 = vadd.xlane.f32.xlu1 %v923_v57 }
 0x38d   : > { %1027 = vperm.xlu0 %1389, %v1392_v58   ;;  %v763_v58 = vld [vmem:[%s424_s9] sm:$0xff]   ;;  %s2081_s9 = sld [smem:[#allocation26_spill]] }
 0x393   : > { %s1049_s16 = scalar_lea.hbm %s2081_s9, %s1300_s18  ;;  %s1591_s30 = scalar_lea.hbm %s2081_s9, 16 }
 0x394   : > { %s1052_s13 = sshll.u32 %s1049_s16, 4  ;;  %s1053_s13 = int_to_ptr.hbm [resolvable:$true] %s1052_s13 }
 0x395   : > { %s1585_s23 = sshra.s32 %s1053_s13, 4  ;;  %s1586_s23 = int_to_ptr.hbm [resolvable:$true] %s1585_s23 }
 0x396   : > { %s1587_s15 = scalar_lea.hbm %s1586_s23, 8  ;;  %p1592_p10 = scmp.lt.s32.totalorder %s1586_s23, %s2081_s9 }
 0x397   : > { %p1588_p4 = scmp.ne.s32.totalorder %s1586_s23, %s1587_s15  ;;  %p1593_p11 = scmp.lt.s32.totalorder %s1591_s30, %s1587_s15 }
 0x399   : > { %p1589_p8 = pnand %p1588_p4, %p1779_p7  ;;  %p1594_p2 = por %p1593_p11, %p1592_p10 }
 0x39b   : > { %p1590_p9 = pneg %p1589_p8 }
 0x39d   : > { %p1595_p12 = pnand %p1594_p2, %p1590_p9 }
 0x3e4   : > { %v870_v62 = vpop.xlane.xlu0 %869 }
 0x3e5   : > { %v929_v14 = vmax.f32 %v840_v59, %v870_v62 }
 0x3ec   : > { %v872_v1 = vpop.xlane.xlu1 %871  ;;  %v900_v2 = vpop.xlane.xlu0 %899 }
 0x3ed   : > { %v930_v3 = vmax.f32 %v842_v60, %v872_v1  ;;  %v932_v4 = vmax.f32 %v900_v2, %v928_v63 }
 0x3ef   : > { %v934_v5 = vmax.f32 %v930_v3, %v932_v4 }
 0x3f1   : > { %v936_v6 = vsub.f32 %v842_v60, %v934_v5  ;;  %v942_v7 = vsub.f32 %v872_v1, %v934_v5  ;;  %v948_v8 = vsub.f32 %v900_v2, %v934_v5  ;;  %v954_v9 = vsub.f32 %v928_v63, %v934_v5  ;;  %v765_v1 = vld [vmem:[%s434_s11] sm:$0xff]   ;;  %s502_s11 = scalar_lea.vmem [#allocation11], %s1887_s0 }
 0x3f2   : > { %v1022_v2 = vlaneseq  ;;  %v1008_v5 = vunpack.c.h.bf16 %v763_v58  ;;  %s2005_s6 = sshll.u32 %s502_s11, 4  ;;  %s1051_s6 = int_to_ptr.vmem [resolvable:$true] %s2005_s6 }
 0x3f3   : > { %v939_v10 = vmul.f32 1.442695, %v936_v6  ;;  %v945_v11 = vmul.f32 1.442695, %v942_v7  ;;  %v951_v12 = vmul.f32 1.442695, %v948_v8 }
 0x3f4   : > { %v926_v13 = vpop.xlane.xlu1 %925  ;;  %v957_v16 = vmul.f32 1.442695, %v954_v9  ;;  %v1016_v9 = vunpack.c.h.bf16 %v765_v1 }
 0x3f5   : > { %1401 = vpow2.f32 %v939_v10  ;;  %v931_v0 = vmax.f32 %v898_v61, %v926_v13 }
 0x3f6   : > { %1403 = vpow2.f32 %v945_v11  ;;  %v1007_v11 = vunpack.c.l.bf16 %v763_v58 }
 0x3f7   : > { %v933_v17 = vmax.f32 %v929_v14, %v931_v0  ;;  %1405 = vpow2.f32 %v951_v12 }
 0x3f8   : > { %1407 = vpow2.f32 %v957_v16  ;;  %v1015_v16 = vunpack.c.l.bf16 %v765_v1 }
 0x3f9   : > { %v935_v21 = vsub.f32 %v840_v59, %v933_v17  ;;  %v941_v22 = vsub.f32 %v870_v62, %v933_v17  ;;  %v947_v23 = vsub.f32 %v898_v61, %v933_v17  ;;  %v953_v24 = vsub.f32 %v926_v13, %v933_v17 }
 0x3fb   : > { %v1402_v25 = vpop.eup %1401  ;;  %v937_v26 = vmul.f32 1.442695, %v935_v21  ;;  %v943_v27 = vmul.f32 1.442695, %v941_v22  ;;  %v949_v29 = vmul.f32 1.442695, %v947_v23 }
 0x3fc   : > { %v1404_v28 = vpop.eup %1403  ;;  %v955_v32 = vmul.f32 1.442695, %v953_v24 }
 0x3fd   : > { %v960_v30 = vadd.f32 %v1404_v28, %v1402_v25  ;;  %1409 = vpow2.f32 %v937_v26  ;;  %v1406_v31 = vpop.eup %1405 }
 0x3fe   : > { %1411 = vpow2.f32 %v943_v27  ;;  %v1408_v34 = vpop.eup %1407 }
 0x3ff   : > { %v962_v33 = vadd.f32 %v1406_v31, %v960_v30  ;;  %1413 = vpow2.f32 %v949_v29 }
 0x400   : > { %1415 = vpow2.f32 %v955_v32 }
 0x401   : > { %v964_v35 = vadd.f32 %v1408_v34, %v962_v33 }
 0x403   : > { %v1410_v36 = vpop.eup %1409  ;;  %1417 = vrcp.f32 %v964_v35  ;;  %v991_v46 = vand.u32 2147483648, %v964_v35  ;;  %v989_v48 = vand.u32 2147483647, %v964_v35  ;;  %vm985_vm14 = vweird.f32 %v964_v35 }
 0x404   : > { %v1412_v37 = vpop.eup %1411 }
 0x405   : > { %v959_v38 = vadd.f32 %v1412_v37, %v1410_v36  ;;  %v1414_v39 = vpop.eup %1413  ;;  %v992_v51 = vor.u32 1.1754944e-38, %v991_v46  ;;  %vm990_vm0 = vcmp.eq.f32.partialorder %v989_v48, 8.507059e+37 }
 0x406   : > { %v1416_v41 = vpop.eup %1415 }
 0x407   : > { %v961_v40 = vadd.f32 %v1414_v39, %v959_v38 }
 0x409   : > { %v1418_v42 = vpop.eup %1417  ;;  %v963_v43 = vadd.f32 %v1416_v41, %v961_v40 }
 0x40a   : > { %v981_v44 = vmul.f32 %v1418_v42, %v964_v35  ;;  %vm986_vm13 = vweird.f32 %v1418_v42 }
 0x40b   : > { %1419 = vrcp.f32 %v963_v43  ;;  %vm987_vm15 = vmor %vm985_vm14, %vm986_vm13  ;;  %v974_v59 = vand.u32 2147483647, %v963_v43  ;;  %v976_v60 = vand.u32 2147483648, %v963_v43  ;;  %vm970_vm2 = vweird.f32 %v963_v43 }
 0x40c   : > { %v982_v45 = vsub.f32 1.0, %v981_v44 }
 0x40d   : > { %v977_v6 = vor.u32 1.1754944e-38, %v976_v60  ;;  %vm975_vm4 = vcmp.eq.f32.partialorder %v974_v59, 8.507059e+37 }
 0x40e   : > { %v983_v47 = vmul.f32 %v1418_v42, %v982_v45 }
 0x410   : > { %v984_v49 = vadd.f32 %v1418_v42, %v983_v47 }
 0x411   : > { %v1420_v50 = vpop.eup %1419 }
 0x412   : > { %v966_v52 = vmul.f32 %v1420_v50, %v963_v43  ;;  %v988_v53 = vsel %vm987_vm15, %v1418_v42, %v984_v49  ;;  %vm971_vm1 = vweird.f32 %v1420_v50 }
 0x413   : > { %v993_v54 = vsel %vm990_vm0, %v992_v51, %v988_v53  ;;  %vm972_vm3 = vmor %vm970_vm2, %vm971_vm1 }
 0x414   : > { %v967_v55 = vsub.f32 1.0, %v966_v52  ;;  %v996_v56 = vmul.f32 %v1402_v25, %v993_v54  ;;  %v1000_v57 = vmul.f32 %v1404_v28, %v993_v54  ;;  %v1006_v4 = vmul.f32 %v1406_v31, %v993_v54  ;;  %v1028_v28 = vpop.permute.xlu0 %1027 }
 0x415   : > { %v1014_v12 = vmul.f32 %v1408_v34, %v993_v54 }
 0x416   : > { %v968_v61 = vmul.f32 %v1420_v50, %v967_v55  ;;  %v998_v62 = vmul.f32 %v996_v56, %v1926_v19  ;;  %v1002_v63 = vmul.f32 %v1000_v57, %v1972_v20  ;;  %v1023_v19 = vshrl.u32 %v1022_v2, 7 }
 0x417   : > { %v1010_v0 = vmul.f32 %v1008_v5, %v1006_v4  ;;  %v1018_v27 = vmul.f32 %v1016_v9, %v1014_v12 }
 0x418   : > { %v969_v3 = vadd.f32 %v1420_v50, %v968_v61  ;;  %v1004_v8 = vadd.f32 %v1002_v63, %v998_v62  ;;  %v1024_v24 = vadd.s32 8, %v1023_v19  ;;  %vm1029_vm5 = vcmp.lt.s32.totalorder %v1023_v19, %v1028_v28 }
 0x41a   : > { %v973_v7 = vsel %vm972_vm3, %v1420_v50, %v969_v3  ;;  %v1012_v22 = vadd.f32 %v1010_v0, %v1004_v8  ;;  %vm1030_vm6 = vcmp.lt.s32.totalorder %v1024_v24, %v1028_v28 }
 0x41b   : > { %v978_v10 = vsel %vm975_vm4, %v977_v6, %v973_v7 }
 0x41c   : > { %v995_v13 = vmul.f32 %v1410_v36, %v978_v10  ;;  %v999_v20 = vmul.f32 %v1412_v37, %v978_v10  ;;  %v1005_v14 = vmul.f32 %v1414_v39, %v978_v10  ;;  %v1013_v23 = vmul.f32 %v1416_v41, %v978_v10 }
 0x41d   : > { %v1020_v31 = vadd.f32 %v1018_v27, %v1012_v22 }
 0x41e   : > { %v997_v17 = vmul.f32 %v995_v13, %v1924_v18  ;;  %v1001_v21 = vmul.f32 %v999_v20, %v1965_v15  ;;  %v1009_v26 = vmul.f32 %v1007_v11, %v1005_v14  ;;  %v1017_v30 = vmul.f32 %v1015_v16, %v1013_v23 }
 0x41f   : > { %v1032_v32 = vsel %vm1030_vm6, %v1020_v31, 0.0 }
 0x420   : > { %v1003_v25 = vadd.f32 %v1001_v21, %v997_v17 }
 0x422   : > { %v1011_v29 = vadd.f32 %v1009_v26, %v1003_v25 }
 0x424   : > { %v1019_v18 = vadd.f32 %v1017_v30, %v1011_v29 }
 0x426   : > { %v1031_v15 = vsel %vm1029_vm5, %v1019_v18, 0.0 }
 0x427   : > { %v1304_v33 = vpack.c.bf16 %v1032_v32, %v1031_v15 }
 0x429   : > { %1305 = vst [vmem:[%s502_s11] sm:$0xff] %v1304_v33  }
 0x42a   : > { %1598 = shalt.err (!%p1595_p12)
}
 0x42b   : > { %s1657_s17 = smov 64   ;;  %s1658_s1 = smov 4  }
 0x42c   : > { %1322 = dma.vmem_to_hbm [thread:$0]  (%p1779_p7), %s1051_s6, 128, %s1053_s13, %s1038_s26, %s1657_s17, %s1657_s17, %s1658_s1  }
 0x42d PF: > { %s2083_s29 = sld [smem:[#allocation17_spill]]  ;;  %p2085_p13 = scmp.ge.s32.totalorder %s1649_s12, 2 }
 0x42f   : > { %p1342_p0 = pnand %p2085_p13, %p1744_p6 }
 0x431   : > { %p1343_p3 = pneg %p1342_p0 }
 0x433   : > { %s1067_s27 = sand.u32 1, %s2083_s29  }
 0x434   : > { %s1068_s14 = scalar_lea.sflag [#allocation4], %s1067_s27 }
 0x435   : > { %1632 = dma.done.wait (%p1343_p3), %s1068_s14, 128  }
 0x436   : > { %1634 = vsyncadd (%p1343_p3), %s1068_s14, 4294967168  ;;  %s2086_s12 = sld [smem:[#allocation20_spill]]  ;;  %s2089_s30 = smov %s1641_s10 }
 0x437   : > { %s2087_s18 = sld [smem:[#allocation18_spill]] }
 0x438   : > { %s2088_s11 = sld [smem:[#allocation21_spill]] }
 0x43c   : > { %p28_p5 = scmp.ge.s32.totalorder %s2086_s12, 4  }
 0x43d   : > { %s2090_s10 = smov %s2087_s18 }
 0x43e   :  { %30 = sbr.rel (!%p28_p5) target bundleno = 14 (0xe), region = 145 }
 0x443   :  { %1074 = vsyncpa [#allocation3], 1 }
 0x444   :  { %1076 = vsyncpa [#allocation3 + $0x1], 1 }
 0x445   :  { %1077 = vsyncpa [#allocation6], 1 }
 0x446   :  { %1079 = vsyncpa [#allocation6 + $0x1], 1 }
 0x447   :  { %1080 = vsyncpa [#allocation9], 1 }
 0x448   :  { %1082 = vsyncpa [#allocation9 + $0x1], 1 }
 0x449   :  { %1083 = vsyncpa [#allocation4], 1 }
 0x44a   :  { %1085 = vsyncpa [#allocation4 + $0x1], 1 }

</bundles_post_ra>
